<compile_context>
chip_gen: v5e
topology: v5e:2x2
jax: 0.10.0
libtpu: 0.0.40
codegen_flags: <defaults>
</compile_context>

<pallas_src>
import functools

import jax
import jax.numpy as jnp
from jax.experimental import pallas as pl
from jax.experimental.pallas import tpu as pltpu

_LANES = 128
_SUBLANES = 8
_TILE_BYTES = 2 * 1024 * 1024   # target bytes per input tile (Pallas double-buffers it)
_TK_ROW_BYTES = 8 * 1024        # dtype-aware cap on bytes per row per tile (-> tk)
_TM_MAX = 4096                  # hard cap on rows per tile


def _round_up(x, m):
    return ((x + m - 1) // m) * m


def _accumulate_block(x_ref, acc_ref, *, valid):
    """acc_ref[...] += row-wise partial sums of the first `valid` columns of x_ref.

    The block is consumed in 128-lane chunks; full chunks are a plain cast+add, the single chunk
    that straddles `valid` gets a lane mask (select -> NaN-safe), and chunks entirely past
    `valid` are skipped.  Accumulating into the VMEM ref per chunk keeps vreg pressure bounded
    even for large row tiles.
    """
    tm = x_ref.shape[0]
    n_full = valid // _LANES
    rem = valid - n_full * _LANES
    for c in range(n_full):
        acc_ref[...] += x_ref[:, c * _LANES:(c + 1) * _LANES].astype(jnp.float32)
    if rem:
        lane = jax.lax.broadcasted_iota(jnp.int32, (tm, _LANES), 1)
        xc = x_ref[:, n_full * _LANES:(n_full + 1) * _LANES].astype(jnp.float32)
        acc_ref[...] += jnp.where(lane < rem, xc, 0.0)


def _gap_single_block_kernel(x_ref, o_ref, *scratch, hw, tk):
    """Fast path: the whole spatial extent fits in one (tm, tk) block; grid is over row blocks."""
    tm = x_ref.shape[0]
    inv = 1.0 / hw
    if tk == _LANES:
        # Single 128-lane chunk (typical CNN head: 7x7 / 8x8 / 10x10): direct masked sum.
        xc = x_ref[...].astype(jnp.float32)
        if hw < tk:
            lane = jax.lax.broadcasted_iota(jnp.int32, (tm, _LANES), 1)
            xc = jnp.where(lane < hw, xc, 0.0)
        o_ref[...] = (jnp.sum(xc, axis=-1, keepdims=True) * inv).astype(o_ref.dtype)
    else:
        acc_ref = scratch[0]
        acc_ref[...] = jnp.zeros_like(acc_ref)
        _accumulate_block(x_ref, acc_ref, valid=hw)
        total = jnp.sum(acc_ref[...], axis=-1, keepdims=True)
        o_ref[...] = (total * inv).astype(o_ref.dtype)


def _gap_multi_block_kernel(x_ref, o_ref, acc_ref, *, hw, tk, num_k):
    """General path: spatial extent tiled over grid axis 1 (reduction axis, 'arbitrary')."""
    k = pl.program_id(1)

    @pl.when(k == 0)
    def _():
        acc_ref[...] = jnp.zeros_like(acc_ref)

    last_valid = hw - (num_k - 1) * tk  # static, in [1, tk]
    if last_valid == tk:
        # H*W is a multiple of tk: no masking anywhere.
        _accumulate_block(x_ref, acc_ref, valid=tk)
    else:
        @pl.when(k < num_k - 1)
        def _():
            _accumulate_block(x_ref, acc_ref, valid=tk)        # unmasked hot loop

        @pl.when(k == num_k - 1)
        def _():
            _accumulate_block(x_ref, acc_ref, valid=last_valid)  # mask only the ragged tail

    @pl.when(k == num_k - 1)
    def _():
        # One cross-lane (XLU) reduce per row block, scaled by the true 1/(H*W).
        total = jnp.sum(acc_ref[...], axis=-1, keepdims=True)
        o_ref[...] = (total * (1.0 / hw)).astype(o_ref.dtype)


def global_avg_pooling(x):
    """x: (N, C, H, W) -> (N, C), matching AdaptiveAvgPool2d(1) + flatten(1)."""
    N, C, H, W = x.shape
    hw = H * W
    rows = N * C
    x2d = x.reshape(rows, hw)  # free for contiguous NCHW
    itemsize = jnp.dtype(x.dtype).itemsize

    # --- spatial tile: lane-aligned, dtype-aware byte cap (2048 f32 / 4096 bf16 lanes) ---
    hw_pad = _round_up(hw, _LANES)
    tk_cap = max(_LANES, (_TK_ROW_BYTES // itemsize) // _LANES * _LANES)
    tk = min(hw_pad, tk_cap)
    num_k = pl.cdiv(hw, tk)

    # --- row tile: grow until the input tile is ~_TILE_BYTES (small hw no longer collapses to
    #     tiny grid steps), multiple of 8; keep >= 2 row blocks so both v7x cores get work ---
    tm_budget = (_TILE_BYTES // (tk * itemsize)) // _SUBLANES * _SUBLANES
    tm_budget = max(_SUBLANES, min(tm_budget, _TM_MAX))
    if rows <= _SUBLANES:
        tm = rows
    else:
        tm = min(tm_budget, _round_up(rows, _SUBLANES))
        if tm >= rows:  # one block would cover all rows -> split for the v7x parallel axis
            tm = max(_SUBLANES, _round_up(pl.cdiv(rows, 2), _SUBLANES))
    num_i = pl.cdiv(rows, tm)

    cost = pl.CostEstimate(
        flops=rows * hw,
        transcendentals=0,
        bytes_accessed=rows * hw * itemsize + rows * itemsize,
    )

    def cparams(sem):
        return pltpu.CompilerParams(dimension_semantics=sem,
                                    vmem_limit_bytes=32 * 1024 * 1024)

    if num_k == 1:
        single_chunk = (tk == _LANES)
        scratch = [] if single_chunk else [pltpu.VMEM((tm, _LANES), jnp.float32)]
        kernel = functools.partial(_gap_single_block_kernel, hw=hw, tk=tk)
        out = pl.pallas_call(
            kernel,
            out_shape=jax.ShapeDtypeStruct((rows, 1), x.dtype),
            grid_spec=pltpu.PrefetchScalarGridSpec(
                num_scalar_prefetch=0,
                grid=(num_i,),
                in_specs=[pl.BlockSpec((tm, tk), lambda i: (i, 0))],
                out_specs=pl.BlockSpec((tm, 1), lambda i: (i, 0)),
                scratch_shapes=scratch,
            ),
            compiler_params=cparams(("parallel",)),
            cost_estimate=cost,
        )(x2d)
    else:
        kernel = functools.partial(_gap_multi_block_kernel, hw=hw, tk=tk, num_k=num_k)
        out = pl.pallas_call(
            kernel,
            out_shape=jax.ShapeDtypeStruct((rows, 1), x.dtype),
            grid_spec=pltpu.PrefetchScalarGridSpec(
                num_scalar_prefetch=0,
                grid=(num_i, num_k),  # reduction (spatial) axis last
                in_specs=[pl.BlockSpec((tm, tk), lambda i, k: (i, k))],
                out_specs=pl.BlockSpec((tm, 1), lambda i, k: (i, 0)),
                scratch_shapes=[pltpu.VMEM((tm, _LANES), jnp.float32)],
            ),
            compiler_params=cparams(("parallel", "arbitrary")),
            cost_estimate=cost,
        )(x2d)

    return out.reshape(N, C)


if __name__ == "__main__":
    key = jax.random.PRNGKey(0)
    N, C, H, W = 2, 4, 16, 16
    x = jax.random.normal(key, (N, C, H, W), dtype=jnp.float32)

    out = global_avg_pooling(x)
    jax.block_until_ready(out)

    ref = jnp.mean(x, axis=(2, 3))
    assert out.shape == (N, C)
    assert jnp.allclose(out, ref, atol=1e-5, rtol=1e-5)

    # Exercise the other code paths at small shapes: single-chunk masked fast path (7x7),
    # multi-chunk single-block bf16, and the multi spatial-block path with a ragged tail.
    extra = [
        ((2, 3, 7, 7), jnp.float32, 1e-5),
        ((2, 4, 20, 20), jnp.bfloat16, 2e-2),
        ((1, 2, 47, 47), jnp.float32, 1e-5),
    ]
    for shape, dt, tol in extra:
        xi = jax.random.normal(jax.random.PRNGKey(1), shape, dtype=jnp.float32).astype(dt)
        oi = global_avg_pooling(xi)
        jax.block_until_ready(oi)
        refi = jnp.mean(xi.astype(jnp.float32), axis=(2, 3))
        assert oi.shape == shape[:2]
        assert jnp.allclose(oi.astype(jnp.float32), refi, atol=tol, rtol=tol)

    print("KERNEL_OK")
</pallas_src>

<mosaic_0001>
module attributes {stable_mosaic.version = 11 : i64} {
  func.func @_gap_single_block_kernel(%arg0: i32, %arg1: memref<8x256xf32, #tpu.memory_space<vmem>>, %arg2: memref<8x1xf32, #tpu.memory_space<vmem>>, %arg3: memref<8x128xf32, #tpu.memory_space<vmem>>) attributes {dimension_semantics = [#tpu.dimension_semantics<parallel>], iteration_bounds = array<i64: 1>, scalar_prefetch = 0 : i64, scratch_operands = 1 : i64, tpu.core_type = #tpu.core_type<tc>, window_params = [{transform_indices = @transform_0, window_bounds = array<i64: 8, 256>}, {transform_indices = @transform_1, window_bounds = array<i64: 8, 1>}]} {
    %cst = arith.constant 0.000000e+00 : f32
    %0 = vector.broadcast %cst : f32 to vector<8x128xf32>
    %c0 = arith.constant 0 : index
    %c0_0 = arith.constant 0 : index
    %1 = vector.load %arg3[%c0, %c0_0] : memref<8x128xf32, #tpu.memory_space<vmem>>, vector<8x128xf32>
    tpu.vector_store %arg3[%c0, %c0_0], %0 {strides = array<i32>} : memref<8x128xf32, #tpu.memory_space<vmem>>, vector<8x128xf32>,
    %c0_1 = arith.constant 0 : index
    %c0_2 = arith.constant 0 : index
    %2 = vector.load %arg3[%c0_1, %c0_2] : memref<8x128xf32, #tpu.memory_space<vmem>>, vector<8x128xf32>
    %c0_3 = arith.constant 0 : index
    %c0_4 = arith.constant 0 : index
    %3 = vector.load %arg1[%c0_3, %c0_4] : memref<8x256xf32, #tpu.memory_space<vmem>>, vector<8x128xf32>
    %4 = arith.addf %2, %3 : vector<8x128xf32>
    %c0_5 = arith.constant 0 : index
    %c0_6 = arith.constant 0 : index
    %5 = vector.load %arg3[%c0_5, %c0_6] : memref<8x128xf32, #tpu.memory_space<vmem>>, vector<8x128xf32>
    tpu.vector_store %arg3[%c0_5, %c0_6], %4 {strides = array<i32>} : memref<8x128xf32, #tpu.memory_space<vmem>>, vector<8x128xf32>,
    %c0_7 = arith.constant 0 : index
    %c0_8 = arith.constant 0 : index
    %6 = vector.load %arg3[%c0_7, %c0_8] : memref<8x128xf32, #tpu.memory_space<vmem>>, vector<8x128xf32>
    %c0_9 = arith.constant 0 : index
    %c128 = arith.constant 128 : index
    %7 = vector.load %arg1[%c0_9, %c128] : memref<8x256xf32, #tpu.memory_space<vmem>>, vector<8x128xf32>
    %8 = arith.addf %6, %7 : vector<8x128xf32>
    %c0_10 = arith.constant 0 : index
    %c0_11 = arith.constant 0 : index
    %9 = vector.load %arg3[%c0_10, %c0_11] : memref<8x128xf32, #tpu.memory_space<vmem>>, vector<8x128xf32>
    tpu.vector_store %arg3[%c0_10, %c0_11], %8 {strides = array<i32>} : memref<8x128xf32, #tpu.memory_space<vmem>>, vector<8x128xf32>,
    %c0_12 = arith.constant 0 : index
    %c0_13 = arith.constant 0 : index
    %10 = vector.load %arg3[%c0_12, %c0_13] : memref<8x128xf32, #tpu.memory_space<vmem>>, vector<8x128xf32>
    %cst_14 = arith.constant dense<0.000000e+00> : vector<8xf32>
    %11 = vector.multi_reduction <add>, %10, %cst_14 [1] : vector<8x128xf32> to vector<8xf32>
    %12 = vector.shape_cast %11 : vector<8xf32> to vector<8x1xf32>
    %cst_15 = arith.constant 3.906250e-03 : f32
    %13 = vector.broadcast %cst_15 : f32 to vector<8x1xf32>
    %14 = arith.mulf %12, %13 : vector<8x1xf32>
    %c0_16 = arith.constant 0 : index
    %c0_17 = arith.constant 0 : index
    %15 = vector.load %arg2[%c0_16, %c0_17] : memref<8x1xf32, #tpu.memory_space<vmem>>, vector<8x1xf32>
    tpu.vector_store %arg2[%c0_16, %c0_17], %14 {strides = array<i32>} : memref<8x1xf32, #tpu.memory_space<vmem>>, vector<8x1xf32>,
    return
  }
  func.func @transform_0(%arg0: i32) -> (i32, i32) {
    %c0_i32 = arith.constant 0 : i32
    %c0_i32_0 = arith.constant 0 : i32
    return %arg0, %c0_i32 : i32, i32
  }
  func.func @transform_1(%arg0: i32) -> (i32, i32) {
    %c0_i32 = arith.constant 0 : i32
    %c0_i32_0 = arith.constant 0 : i32
    return %arg0, %c0_i32 : i32, i32
  }
}

</mosaic_0001>

<bundles_post_ra>
// kernel: tpu_custom_call.1
= control target key start
LH: loop header
LB: loop body
LE: loop exit
PB: predicated region body
PF: predicated region fallthrough
CT: control target
= control target key end

     0   :  { %6 = vsyncpa [#allocation4], 0  ;;  %s69_s9 = smov [#allocation3]   ;;  %s86_s0 = inlined_call_operand.hbm [shape: f32[8,256], index: 0, kind: input, shape index: {}]   ;;  %s87_s1 = inlined_call_operand.vmem [shape: f32[8,1], index: 1, kind: output, shape index: {}]  }
   0x1   :  { %s12_s8 = sshll.u32 %s86_s0, 4  ;;  %s14_s10 = sshll.u32 %s69_s9, 4  ;;  %s13_s8 = int_to_ptr.hbm [resolvable:$true] %s12_s8  ;;  %s15_s10 = int_to_ptr.vmem [resolvable:$true] %s14_s10 }
   0x2   :  { %17 = dma.hbm_to_vmem [thread:$0]  %s13_s8, 256, %s15_s10, [#allocation4]  }
   0x3   :  { %67 = dma.done.wait [#allocation4], 256  }
   0x4   :  { %68 = vsyncadd [#allocation4], 4294967040  ;;  %v24_v0 = vld [vmem:[#allocation3] sm:$0xff]  ;;  %v28_v1 = vld [vmem:[#allocation3 + $0x8] sm:$0xff]  ;;  %vm35_vm0 = vcmask 7168  }
   0x5   :  { %v29_v2 = vadd.f32 %v28_v1, %v24_v0 }
   0x7   :  { %32 = vadd.xlane.f32.xlu0 %v29_v2 }
  0x7a   :  { %v33_v3 = vpop.xlane.xlu0 %32 }
  0x7b   :  { %v34_v4 = vmul.f32 0.00390625, %v33_v3 }
  0x7d   :  { %36 = vst.msk [vmem:[%s87_s1] sm:$0xff] %vm35_vm0, %v34_v4 }
  0x7e   :  { %41 = vsyncpa [#allocation4], 1 }

</bundles_post_ra>
